<compile_context>
chip_gen: v7x
topology: tpu7x:2x2x1
jax: 0.10.0
libtpu: 0.0.40
codegen_flags: <defaults>
</compile_context>

<pallas_src>
import jax
import jax.numpy as jnp
from jax import lax
from jax.experimental import pallas as pl
from jax.experimental.pallas import tpu as pltpu


def _round_up(x, m):
    return ((x + m - 1) // m) * m


def _num_tensorcores():
    """v7x has 2 TensorCores per chip; v5e/v6e have 1.  Best-effort detect."""
    try:
        kind = jax.devices()[0].device_kind.lower()
        if "v7" in kind:
            return 2
    except Exception:
        pass
    return 1


def _vmem_budget_bytes():
    """Per-kernel VMEM budget, leaving headroom under physical capacity."""
    try:
        cap = pltpu.get_tpu_info().vmem_capacity_bytes
        return min(cap * 3 // 4, 96 << 20)
    except Exception:
        # Conservative fallback: safe even on v7x (64 MiB physical per TC).
        return 40 << 20


def _tile_plan(n, d, x_itemsize, tm=None):
    """Pick the row-tile size and the scoped VMEM limit.

    VMEM accounting uses padded-lane footprints:
      * X tile:   tm x round_up(D,128) x itemsize, double-buffered
      * out tile: tm x 128 (lane-padded (tm,1) f32), double-buffered
      * weight:   round_up(D,8) x 128 (grid-invariant, counted x2 to be safe)
    """
    d_pad = _round_up(max(d, 1), 128)
    per_row = 2 * d_pad * x_itemsize + 2 * 128 * 4
    w_bytes = 2 * _round_up(max(d, 1), 8) * 128 * x_itemsize

    if tm is None:
        budget = _vmem_budget_bytes()
        tm_budget = max(128, ((budget - w_bytes) // per_row) // 128 * 128)
        n_tc = _num_tensorcores()
        n_splits = max(n_tc, pl.cdiv(n, tm_budget))
        if n_tc > 1:
            # Even grid length so both TensorCores get work on v7x.
            n_splits = _round_up(n_splits, n_tc)
        tm = min(tm_budget, _round_up(pl.cdiv(n, n_splits), 128))

    tm = max(8, min(tm, _round_up(n, 8)))          # never exceed the array
    need = tm * per_row + w_bytes
    vmem_limit = int(max(need + (4 << 20), 16 << 20))
    return tm, vmem_limit


def mos_tmp_kernel(x_ref, w_ref, b_ref, tmp_ref):
    """Per-row-tile body: tmp = X_tile @ w_col + b.

    x_ref   : (tm, D) VMEM  row tile of X, streamed in its native dtype
    w_ref   : (D, 1)  VMEM  pre-transposed SVM weight column (grid-invariant)
    b_ref   : (1,)    SMEM  SVM bias
    tmp_ref : (tm, 1) VMEM  f32 SVM scores for this tile
    """
    # Canonical (tm, D) @ (D, 1) MXU matmul with f32 accumulation; X is never
    # transposed in-kernel, bf16 inputs upcast through the MXU, not the VPU.
    tmp_ref[...] = (
        jnp.dot(x_ref[...], w_ref[...], preferred_element_type=jnp.float32)
        + b_ref[0]
    )


def mos_alter_fx_forward(X, params, chunk=5120, tm=None):
    """Pallas forward for MoS_alter_fx with svm_num == 1."""
    w_svm = params["w_svm"]                          # (1, D)
    b_svm = params["b_svm"].astype(jnp.float32)      # (1,)
    w_vote = params["w_vote"].astype(jnp.float32)    # (1, 1)

    # Reproduce the hard-coded python slice X[0*5120:(0+1)*5120] (clips).
    x0 = X[0:chunk]                                  # native dtype, no copy
    N, D = x0.shape

    # Only the tiny weight column is cast to X's dtype (MXU does the upcast
    # with f32 accumulation for bf16 inputs).
    w_col = w_svm.T.astype(x0.dtype)                 # (D, 1)

    tm, vmem_limit = _tile_plan(N, D, x0.dtype.itemsize, tm=tm)
    grid = (pl.cdiv(N, tm),)                         # ragged last block is fine

    itemsize = x0.dtype.itemsize
    cost = pl.CostEstimate(
        flops=2 * N * D,
        transcendentals=0,
        bytes_accessed=N * D * itemsize + D * itemsize + N * 4 + 4,
    )

    tmp = pl.pallas_call(
        mos_tmp_kernel,
        out_shape=jax.ShapeDtypeStruct((N, 1), jnp.float32),
        grid=grid,
        in_specs=[
            pl.BlockSpec((tm, D), lambda i: (i, 0)),            # X row tile (streamed)
            pl.BlockSpec((D, 1), lambda i: (0, 0)),             # weight column (one DMA)
            pl.BlockSpec(memory_space=pltpu.MemorySpace.SMEM),  # bias scalar
        ],
        out_specs=pl.BlockSpec((tm, 1), lambda i: (i, 0)),      # tmp tile
        compiler_params=pltpu.CompilerParams(
            dimension_semantics=("parallel",),
            vmem_limit_bytes=vmem_limit,
        ),
        cost_estimate=cost,
    )(x0, w_col, b_svm)

    # Tiny fused XLA epilogue, bit-consistent with the kernel's tmp[0]:
    #   vote_weight = sigmoid(t @ w_vote^T);  predict = vote_weight[0] * tmp
    vote_w0 = jax.nn.sigmoid(tmp[0:1] * w_vote[0, 0])            # (1, 1)
    predict = vote_w0 * tmp                                      # (N, 1)
    # Return (predict, tmp_list) like the PyTorch module.
    return predict, [tmp]


def mos_alter_fx_reference(X, params, chunk=5120):
    """Pure-JAX reference matching the PyTorch forward exactly (svm_num=1)."""
    w_svm, b_svm, w_vote = params["w_svm"], params["b_svm"], params["w_vote"]
    x0 = X[0:chunk]
    tmp = x0 @ w_svm.T + b_svm                       # (N, 1)
    t = tmp                                          # cat of one
    vote_weight = jax.nn.sigmoid(t @ w_vote.T)       # (N, 1)
    predict = vote_weight[0] * tmp                   # row-0 broadcast
    return predict, [tmp]


def init_params(key, dim, svm_num=1):
    """Deterministic parameter init mirroring the module's __init__ shapes."""
    k1, k2, k3, k4 = jax.random.split(key, 4)
    scale = 1.0 / jnp.sqrt(dim)
    params = {
        # SVM(dim, 1): nn.Linear(dim, 1)
        "w_svm": jax.random.uniform(k1, (1, dim), jnp.float32, -scale, scale),
        "b_svm": jax.random.uniform(k2, (1,), jnp.float32, -scale, scale),
        # vote: nn.Linear(svm_num, svm_num, bias=False)
        "w_vote": jax.random.uniform(k3, (svm_num, svm_num), jnp.float32,
                                     -1.0, 1.0),
        # gate: nn.Linear(svm_num*dim, svm_num, bias=False) -- unused in fwd
        "w_gate": jax.random.uniform(k4, (svm_num, svm_num * dim),
                                     jnp.float32, -scale, scale),
    }
    return params


if __name__ == "__main__":
    key = jax.random.PRNGKey(0)
    kx, kp = jax.random.split(key)

    DIM = 32      # input feature dim
    N = 512       # number of rows (< 5120, so X[0:5120] == X, as in PyTorch)

    X = jax.random.normal(kx, (N, DIM), dtype=jnp.float32)
    params = init_params(kp, DIM, svm_num=1)

    ref_pred, ref_tmp = mos_alter_fx_reference(X, params)

    # 1) Auto tile plan: one step on v5e/v6e, even >=2-step grid on v7x.
    predict, tmp_list = mos_alter_fx_forward(X, params)
    predict = jax.block_until_ready(predict)
    tmp_list = [jax.block_until_ready(t) for t in tmp_list]
    assert jnp.allclose(predict, ref_pred, atol=1e-4, rtol=1e-4)
    assert jnp.allclose(tmp_list[0], ref_tmp[0], atol=1e-4, rtol=1e-4)

    # 2) Forced small tile: multi-step pipelined grid (tm=128 -> 4 tiles).
    predict2, tmp_list2 = mos_alter_fx_forward(X, params, tm=128)
    predict2 = jax.block_until_ready(predict2)
    tmp_list2 = [jax.block_until_ready(t) for t in tmp_list2]
    assert jnp.allclose(predict2, ref_pred, atol=1e-4, rtol=1e-4)
    assert jnp.allclose(tmp_list2[0], ref_tmp[0], atol=1e-4, rtol=1e-4)

    # 3) Ragged row count (no wrapper-side padding copy): last block partial.
    Nr = 300
    Xr = X[:Nr]
    ref_pred_r, ref_tmp_r = mos_alter_fx_reference(Xr, params)
    predict3, tmp_list3 = mos_alter_fx_forward(Xr, params, tm=128)
    predict3 = jax.block_until_ready(predict3)
    tmp_list3 = [jax.block_until_ready(t) for t in tmp_list3]
    assert jnp.allclose(predict3, ref_pred_r, atol=1e-4, rtol=1e-4)
    assert jnp.allclose(tmp_list3[0], ref_tmp_r[0], atol=1e-4, rtol=1e-4)

    print("KERNEL_OK")
</pallas_src>

<mosaic_0001>
module attributes {stable_mosaic.version = 11 : i64} {
  func.func @mos_tmp_kernel(%arg0: i32, %arg1: memref<512x32xf32, #tpu.memory_space<vmem>>, %arg2: memref<32x1xf32, #tpu.memory_space<vmem>>, %arg3: memref<1xf32, #tpu.memory_space<smem>>, %arg4: memref<512x1xf32, #tpu.memory_space<vmem>>) attributes {dimension_semantics = [#tpu.dimension_semantics<parallel>], iteration_bounds = array<i64: 1>, scalar_prefetch = 0 : i64, scratch_operands = 0 : i64, tpu.core_type = #tpu.core_type<tc>, window_params = [{transform_indices = @transform_0, window_bounds = array<i64: 512, 32>}, {pipeline_mode = #tpu.pipeline_mode<synchronous>, transform_indices = @transform_1, window_bounds = array<i64: 32, 1>}, {transform_indices = @transform_2, window_bounds = array<i64: 1>}, {transform_indices = @transform_3, window_bounds = array<i64: 512, 1>}]} {
    %c0 = arith.constant 0 : index
    %c0_0 = arith.constant 0 : index
    %0 = vector.load %arg1[%c0, %c0_0] : memref<512x32xf32, #tpu.memory_space<vmem>>, vector<512x32xf32>
    %c0_1 = arith.constant 0 : index
    %c0_2 = arith.constant 0 : index
    %1 = vector.load %arg2[%c0_1, %c0_2] : memref<32x1xf32, #tpu.memory_space<vmem>>, vector<32x1xf32>
    %cst = arith.constant dense<0.000000e+00> : vector<512x1xf32>
    %2 = tpu.matmul %0, %1, %cst {dimension_numbers = #tpu.dot_dimension_numbers<[1], [0], [0], [1], [0, 0, 1, 1], [], []>} : vector<512x32xf32>, vector<32x1xf32>, vector<512x1xf32> -> vector<512x1xf32>
    %c0_3 = arith.constant 0 : index
    %3 = memref.load %arg3[%c0_3] : memref<1xf32, #tpu.memory_space<smem>>
    %4 = vector.broadcast %3 : f32 to vector<512x1xf32>
    %5 = arith.addf %2, %4 : vector<512x1xf32>
    %c0_4 = arith.constant 0 : index
    %c0_5 = arith.constant 0 : index
    %6 = vector.load %arg4[%c0_4, %c0_5] : memref<512x1xf32, #tpu.memory_space<vmem>>, vector<512x1xf32>
    tpu.vector_store %arg4[%c0_4, %c0_5], %5 {strides = array<i32>} : memref<512x1xf32, #tpu.memory_space<vmem>>, vector<512x1xf32>,
    return
  }
  func.func @transform_0(%arg0: i32) -> (i32, i32) {
    %c0_i32 = arith.constant 0 : i32
    %c0_i32_0 = arith.constant 0 : i32
    return %arg0, %c0_i32 : i32, i32
  }
  func.func @transform_1(%arg0: i32) -> (i32, i32) {
    %c0_i32 = arith.constant 0 : i32
    %c0_i32_0 = arith.constant 0 : i32
    %c0_i32_1 = arith.constant 0 : i32
    return %c0_i32, %c0_i32_0 : i32, i32
  }
  func.func @transform_2(%arg0: i32) -> i32 {
    %c0_i32 = arith.constant 0 : i32
    %c0_i32_0 = arith.constant 0 : i32
    return %c0_i32 : i32
  }
  func.func @transform_3(%arg0: i32) -> (i32, i32) {
    %c0_i32 = arith.constant 0 : i32
    %c0_i32_0 = arith.constant 0 : i32
    return %arg0, %c0_i32 : i32, i32
  }
}

</mosaic_0001>

<bundles_post_ra>
// kernel: tpu_custom_call.1
= control target key start
LH: loop header
LB: loop body
LE: loop exit
PB: predicated region body
PF: predicated region fallthrough
CT: control target
= control target key end

     0   :  { %vm85_vm0 = vcmask 261120   ;;  %vm663_vm1 = vcmask 7168   ;;  %s1593_s1 = inlined_call_operand.vmem [shape: f32[32,1], index: 1, kind: input, shape index: {}]   ;;  %s1594_s0 = inlined_call_operand.vmem [shape: f32[512,32], index: 0, kind: input, shape index: {}]   ;;  %s1595_s2 = inlined_call_operand.<no memory space> [shape: f32[1], index: 2, kind: input, shape index: {}]   ;;  %s1596_s3 = inlined_call_operand.vmem [shape: f32[512,1], index: 3, kind: output, shape index: {}]  }
   0x1   :  { %v79_v0 = vld [vmem:[%s1593_s1] sm:$0xff]  ;;  %v80_v1 = vld [vmem:[%s1593_s1 + $0x8] sm:$0xff]  ;;  %v81_v2 = vld [vmem:[%s1593_s1 + $0x10] sm:$0xff] }
   0x2   :  { %v968_v3 = vpack.c.bf16 %v80_v1, %v79_v0  ;;  %v82_v4 = vld [vmem:[%s1593_s1 + $0x18] sm:$0xff]  ;;  %v15_v5 = vld [vmem:[%s1594_s0] sm:$0xff]  ;;  %v16_v8 = vld [vmem:[%s1594_s0 + $0x8] sm:$0xff] }
   0x3   :  { %v47_v6 = vld [vmem:[%s1594_s0 + $0x100] sm:$0xff]  ;;  %v972_v7 = vpack.c.bf16 %v82_v4, %v81_v2  ;;  %872 = vmatprep.mubr.msk.f32.mxu0 %vm85_vm0, %v15_v5  ;;  %v48_v9 = vld [vmem:[%s1594_s0 + $0x108] sm:$0xff]  ;;  %v17_v10 = vld [vmem:[%s1594_s0 + $0x10] sm:$0xff] }
   0x4   :  { %920 = vmatprep.mubr.msk.f32.mxu1 %vm85_vm0, %v47_v6  ;;  %969 = vmatprep.subr.bf16.mxu0 %v968_v3  ;;  %v49_v11 = vld [vmem:[%s1594_s0 + $0x110] sm:$0xff]  ;;  %v18_v12 = vld [vmem:[%s1594_s0 + $0x18] sm:$0xff]  ;;  %v19_v14 = vld [vmem:[%s1594_s0 + $0x20] sm:$0xff]  ;;  %v1271_v6 = vstv %s1595_s2 }
   0x5   :  { %976 = vmatprep.subr.bf16.mxu1 %v968_v3  ;;  %971 = vmatpush3.bf16.msra.mxu0 %v968_v3  ;;  %v50_v13 = vld [vmem:[%s1594_s0 + $0x118] sm:$0xff]  ;;  %v51_v15 = vld [vmem:[%s1594_s0 + $0x120] sm:$0xff]  ;;  %v20_v16 = vld [vmem:[%s1594_s0 + $0x28] sm:$0xff] }
   0x6   :  { %978 = vmatpush3.bf16.msra.mxu1 %v968_v3  ;;  %973 = vmatprep.subr.bf16.mxu0 %v972_v7  ;;  %v52_v17 = vld [vmem:[%s1594_s0 + $0x128] sm:$0xff]  ;;  %v21_v18 = vld [vmem:[%s1594_s0 + $0x30] sm:$0xff]  ;;  %v22_v20 = vld [vmem:[%s1594_s0 + $0x38] sm:$0xff] }
   0x7   :  { %977 = vmatprep.subr.bf16.mxu1 %v972_v7  ;;  %v53_v19 = vld [vmem:[%s1594_s0 + $0x130] sm:$0xff]  ;;  %v54_v21 = vld [vmem:[%s1594_s0 + $0x138] sm:$0xff]  ;;  %v23_v22 = vld [vmem:[%s1594_s0 + $0x40] sm:$0xff] }
   0x8   :  { %v55_v23 = vld [vmem:[%s1594_s0 + $0x140] sm:$0xff]  ;;  %v24_v24 = vld [vmem:[%s1594_s0 + $0x48] sm:$0xff]  ;;  %v25_v26 = vld [vmem:[%s1594_s0 + $0x50] sm:$0xff] }
   0x9   :  { %975 = vmatpush3.bf16.msra.mxu0 %v972_v7  ;;  %v56_v25 = vld [vmem:[%s1594_s0 + $0x148] sm:$0xff]  ;;  %v57_v27 = vld [vmem:[%s1594_s0 + $0x150] sm:$0xff]  ;;  %v26_v28 = vld [vmem:[%s1594_s0 + $0x58] sm:$0xff] }
   0xa   :  { %979 = vmatpush3.bf16.msra.mxu1 %v972_v7  ;;  %v58_v29 = vld [vmem:[%s1594_s0 + $0x158] sm:$0xff]  ;;  %v27_v30 = vld [vmem:[%s1594_s0 + $0x60] sm:$0xff]  ;;  %v28_v32 = vld [vmem:[%s1594_s0 + $0x68] sm:$0xff] }
   0xb   :  { %v59_v31 = vld [vmem:[%s1594_s0 + $0x160] sm:$0xff]  ;;  %v60_v33 = vld [vmem:[%s1594_s0 + $0x168] sm:$0xff]  ;;  %v29_v34 = vld [vmem:[%s1594_s0 + $0x70] sm:$0xff] }
   0xc   :  { %873 = vmatmul.mubr.msk.f32.vlgmr.msra.gmra.mrb[0].mxu0 %vm85_vm0, %v16_v8  ;;  %v61_v35 = vld [vmem:[%s1594_s0 + $0x170] sm:$0xff]  ;;  %v30_v36 = vld [vmem:[%s1594_s0 + $0x78] sm:$0xff]  ;;  %v31_v38 = vld [vmem:[%s1594_s0 + $0x80] sm:$0xff] }
   0xd   :  { %921 = vmatmul.mubr.msk.f32.vlgmr.msra.gmra.mrb[0].mxu1 %vm85_vm0, %v48_v9  ;;  %875 = vmatprep.mubr.msk.f32.mxu0 %vm85_vm0, %v17_v10  ;;  %v62_v37 = vld [vmem:[%s1594_s0 + $0x178] sm:$0xff]  ;;  %v63_v39 = vld [vmem:[%s1594_s0 + $0x180] sm:$0xff]  ;;  %v32_v40 = vld [vmem:[%s1594_s0 + $0x88] sm:$0xff] }
   0xe   :  { %923 = vmatprep.mubr.msk.f32.mxu1 %vm85_vm0, %v49_v11  ;;  %v64_v41 = vld [vmem:[%s1594_s0 + $0x188] sm:$0xff]  ;;  %v33_v42 = vld [vmem:[%s1594_s0 + $0x90] sm:$0xff]  ;;  %v34_v44 = vld [vmem:[%s1594_s0 + $0x98] sm:$0xff] }
   0xf   :  { %v65_v43 = vld [vmem:[%s1594_s0 + $0x190] sm:$0xff]  ;;  %v66_v45 = vld [vmem:[%s1594_s0 + $0x198] sm:$0xff]  ;;  %v35_v46 = vld [vmem:[%s1594_s0 + $0xa0] sm:$0xff] }
  0x10   :  { %876 = vmatmul.mubr.msk.f32.gmra.mrb[2].mxu0 %vm85_vm0, %v18_v12  ;;  %v67_v47 = vld [vmem:[%s1594_s0 + $0x1a0] sm:$0xff]  ;;  %v36_v48 = vld [vmem:[%s1594_s0 + $0xa8] sm:$0xff]  ;;  %v37_v50 = vld [vmem:[%s1594_s0 + $0xb0] sm:$0xff] }
  0x11   :  { %924 = vmatmul.mubr.msk.f32.gmra.mrb[2].mxu1 %vm85_vm0, %v50_v13  ;;  %878 = vmatprep.mubr.msk.f32.mxu0 %vm85_vm0, %v19_v14  ;;  %v68_v49 = vld [vmem:[%s1594_s0 + $0x1a8] sm:$0xff]  ;;  %v69_v51 = vld [vmem:[%s1594_s0 + $0x1b0] sm:$0xff]  ;;  %v38_v52 = vld [vmem:[%s1594_s0 + $0xb8] sm:$0xff] }
  0x12   :  { %926 = vmatprep.mubr.msk.f32.mxu1 %vm85_vm0, %v51_v15  ;;  %v70_v53 = vld [vmem:[%s1594_s0 + $0x1b8] sm:$0xff]  ;;  %v39_v54 = vld [vmem:[%s1594_s0 + $0xc0] sm:$0xff]  ;;  %v40_v56 = vld [vmem:[%s1594_s0 + $0xc8] sm:$0xff] }
  0x13   :  { %v71_v55 = vld [vmem:[%s1594_s0 + $0x1c0] sm:$0xff]  ;;  %v72_v57 = vld [vmem:[%s1594_s0 + $0x1c8] sm:$0xff]  ;;  %v41_v58 = vld [vmem:[%s1594_s0 + $0xd0] sm:$0xff] }
  0x14   :  { %879 = vmatmul.mubr.msk.f32.gmra.mrb[4].mxu0 %vm85_vm0, %v20_v16  ;;  %v73_v59 = vld [vmem:[%s1594_s0 + $0x1d0] sm:$0xff]  ;;  %v42_v60 = vld [vmem:[%s1594_s0 + $0xd8] sm:$0xff]  ;;  %v43_v62 = vld [vmem:[%s1594_s0 + $0xe0] sm:$0xff] }
  0x15   :  { %927 = vmatmul.mubr.msk.f32.gmra.mrb[4].mxu1 %vm85_vm0, %v52_v17  ;;  %881 = vmatprep.mubr.msk.f32.mxu0 %vm85_vm0, %v21_v18  ;;  %v74_v61 = vld [vmem:[%s1594_s0 + $0x1d8] sm:$0xff]  ;;  %v75_v63 = vld [vmem:[%s1594_s0 + $0x1e0] sm:$0xff]  ;;  %v44_v0 = vld [vmem:[%s1594_s0 + $0xe8] sm:$0xff] }
  0x16   :  { %929 = vmatprep.mubr.msk.f32.mxu1 %vm85_vm0, %v53_v19  ;;  %v76_v1 = vld [vmem:[%s1594_s0 + $0x1e8] sm:$0xff]  ;;  %v45_v2 = vld [vmem:[%s1594_s0 + $0xf0] sm:$0xff]  ;;  %v46_v4 = vld [vmem:[%s1594_s0 + $0xf8] sm:$0xff] }
  0x17   :  { %v77_v3 = vld [vmem:[%s1594_s0 + $0x1f0] sm:$0xff]  ;;  %v78_v5 = vld [vmem:[%s1594_s0 + $0x1f8] sm:$0xff] }
  0x18   :  { %882 = vmatmul.mubr.msk.f32.gmra.mrb[6].mxu0 %vm85_vm0, %v22_v20 }
  0x19   :  { %930 = vmatmul.mubr.msk.f32.gmra.mrb[6].mxu1 %vm85_vm0, %v54_v21  ;;  %884 = vmatprep.mubr.msk.f32.mxu0 %vm85_vm0, %v23_v22 }
  0x1a   :  { %932 = vmatprep.mubr.msk.f32.mxu1 %vm85_vm0, %v55_v23 }
  0x1c   :  { %885 = vmatmul.mubr.msk.f32.gmra.mrb[8].mxu0 %vm85_vm0, %v24_v24 }
  0x1d   :  { %933 = vmatmul.mubr.msk.f32.gmra.mrb[8].mxu1 %vm85_vm0, %v56_v25  ;;  %887 = vmatprep.mubr.msk.f32.mxu0 %vm85_vm0, %v25_v26 }
  0x1e   :  { %935 = vmatprep.mubr.msk.f32.mxu1 %vm85_vm0, %v57_v27 }
  0x20   :  { %888 = vmatmul.mubr.msk.f32.gmra.mrb[10].mxu0 %vm85_vm0, %v26_v28 }
  0x21   :  { %936 = vmatmul.mubr.msk.f32.gmra.mrb[10].mxu1 %vm85_vm0, %v58_v29  ;;  %890 = vmatprep.mubr.msk.f32.mxu0 %vm85_vm0, %v27_v30 }
  0x22   :  { %938 = vmatprep.mubr.msk.f32.mxu1 %vm85_vm0, %v59_v31 }
  0x24   :  { %891 = vmatmul.mubr.msk.f32.gmra.mrb[12].mxu0 %vm85_vm0, %v28_v32 }
  0x25   :  { %939 = vmatmul.mubr.msk.f32.gmra.mrb[12].mxu1 %vm85_vm0, %v60_v33  ;;  %893 = vmatprep.mubr.msk.f32.mxu0 %vm85_vm0, %v29_v34 }
  0x26   :  { %941 = vmatprep.mubr.msk.f32.mxu1 %vm85_vm0, %v61_v35 }
  0x28   :  { %894 = vmatmul.mubr.msk.f32.gmra.mrb[14].mxu0 %vm85_vm0, %v30_v36 }
  0x29   :  { %942 = vmatmul.mubr.msk.f32.gmra.mrb[14].mxu1 %vm85_vm0, %v62_v37  ;;  %896 = vmatprep.mubr.msk.f32.mxu0 %vm85_vm0, %v31_v38 }
  0x2a   :  { %944 = vmatprep.mubr.msk.f32.mxu1 %vm85_vm0, %v63_v39 }
  0x2c   :  { %897 = vmatmul.mubr.msk.f32.gmra.mrb[16].mxu0 %vm85_vm0, %v32_v40 }
  0x2d   :  { %945 = vmatmul.mubr.msk.f32.gmra.mrb[16].mxu1 %vm85_vm0, %v64_v41  ;;  %899 = vmatprep.mubr.msk.f32.mxu0 %vm85_vm0, %v33_v42 }
  0x2e   :  { %947 = vmatprep.mubr.msk.f32.mxu1 %vm85_vm0, %v65_v43 }
  0x30   :  { %900 = vmatmul.mubr.msk.f32.gmra.mrb[18].mxu0 %vm85_vm0, %v34_v44 }
  0x31   :  { %948 = vmatmul.mubr.msk.f32.gmra.mrb[18].mxu1 %vm85_vm0, %v66_v45  ;;  %902 = vmatprep.mubr.msk.f32.mxu0 %vm85_vm0, %v35_v46 }
  0x32   :  { %950 = vmatprep.mubr.msk.f32.mxu1 %vm85_vm0, %v67_v47 }
  0x34   :  { %903 = vmatmul.mubr.msk.f32.gmra.mrb[20].mxu0 %vm85_vm0, %v36_v48 }
  0x35   :  { %951 = vmatmul.mubr.msk.f32.gmra.mrb[20].mxu1 %vm85_vm0, %v68_v49  ;;  %905 = vmatprep.mubr.msk.f32.mxu0 %vm85_vm0, %v37_v50 }
  0x36   :  { %953 = vmatprep.mubr.msk.f32.mxu1 %vm85_vm0, %v69_v51 }
  0x38   :  { %906 = vmatmul.mubr.msk.f32.gmra.mrb[22].mxu0 %vm85_vm0, %v38_v52 }
  0x39   :  { %954 = vmatmul.mubr.msk.f32.gmra.mrb[22].mxu1 %vm85_vm0, %v70_v53  ;;  %908 = vmatprep.mubr.msk.f32.mxu0 %vm85_vm0, %v39_v54 }
  0x3a   :  { %956 = vmatprep.mubr.msk.f32.mxu1 %vm85_vm0, %v71_v55 }
  0x3c   :  { %909 = vmatmul.mubr.msk.f32.gmra.mrb[24].mxu0 %vm85_vm0, %v40_v56 }
  0x3d   :  { %957 = vmatmul.mubr.msk.f32.gmra.mrb[24].mxu1 %vm85_vm0, %v72_v57  ;;  %911 = vmatprep.mubr.msk.f32.mxu0 %vm85_vm0, %v41_v58 }
  0x3e   :  { %959 = vmatprep.mubr.msk.f32.mxu1 %vm85_vm0, %v73_v59 }
  0x40   :  { %912 = vmatmul.mubr.msk.f32.gmra.mrb[26].mxu0 %vm85_vm0, %v42_v60 }
  0x41   :  { %960 = vmatmul.mubr.msk.f32.gmra.mrb[26].mxu1 %vm85_vm0, %v74_v61  ;;  %914 = vmatprep.mubr.msk.f32.mxu0 %vm85_vm0, %v43_v62 }
  0x42   :  { %962 = vmatprep.mubr.msk.f32.mxu1 %vm85_vm0, %v75_v63 }
  0x44   :  { %915 = vmatmul.mubr.msk.f32.gmra.mrb[28].mxu0 %vm85_vm0, %v44_v0 }
  0x45   :  { %963 = vmatmul.mubr.msk.f32.gmra.mrb[28].mxu1 %vm85_vm0, %v76_v1  ;;  %917 = vmatprep.mubr.msk.f32.mxu0 %vm85_vm0, %v45_v2 }
  0x46   :  { %965 = vmatprep.mubr.msk.f32.mxu1 %vm85_vm0, %v77_v3 }
  0x48   :  { %918 = vmatmul.mubr.msk.f32.gmra.mrb[30].mxu0 %vm85_vm0, %v46_v4 }
  0x49   :  { %966 = vmatmul.mubr.msk.f32.gmra.mrb[30].mxu1 %vm85_vm0, %v78_v5 }
  0xdf   :  { %v874_v7 = vpop.f32.mrb[0].mxu0 }
  0xe0   :  { %v922_v8 = vpop.f32.mrb[0].mxu1  ;;  %v350_v9 = vadd.f32 %v874_v7, %v1271_v6  ;;  %v344_v11 = vpop.f32.mrb[1].mxu0 }
  0xe1   :  { %v510_v10 = vadd.f32 %v922_v8, %v1271_v6  ;;  %v504_v12 = vpop.f32.mrb[1].mxu1  ;;  %v345_v13 = vadd.f32 %v344_v11, %v1271_v6 }
  0xe2   :  { %v505_v14 = vadd.f32 %v504_v12, %v1271_v6  ;;  %665 = vst.msk [vmem:[%s1596_s3 + $0x8] sm:$0xff] %vm663_vm1, %v350_v9 }
  0xe3   :  { %697 = vst.msk [vmem:[%s1596_s3 + $0x108] sm:$0xff] %vm663_vm1, %v510_v10  ;;  %664 = vst.msk [vmem:[%s1596_s3] sm:$0xff] %vm663_vm1, %v345_v13  ;;  %v877_v15 = vpop.f32.mrb[2].mxu0 }
  0xe4   :  { %696 = vst.msk [vmem:[%s1596_s3 + $0x100] sm:$0xff] %vm663_vm1, %v505_v14  ;;  %v925_v16 = vpop.f32.mrb[2].mxu1  ;;  %v360_v17 = vadd.f32 %v877_v15, %v1271_v6  ;;  %v354_v19 = vpop.f32.mrb[3].mxu0 }
  0xe5   :  { %v520_v18 = vadd.f32 %v925_v16, %v1271_v6  ;;  %v514_v20 = vpop.f32.mrb[3].mxu1  ;;  %v355_v21 = vadd.f32 %v354_v19, %v1271_v6 }
  0xe6   :  { %v515_v22 = vadd.f32 %v514_v20, %v1271_v6  ;;  %667 = vst.msk [vmem:[%s1596_s3 + $0x18] sm:$0xff] %vm663_vm1, %v360_v17 }
  0xe7   :  { %699 = vst.msk [vmem:[%s1596_s3 + $0x118] sm:$0xff] %vm663_vm1, %v520_v18  ;;  %666 = vst.msk [vmem:[%s1596_s3 + $0x10] sm:$0xff] %vm663_vm1, %v355_v21  ;;  %v880_v23 = vpop.f32.mrb[4].mxu0 }
  0xe8   :  { %698 = vst.msk [vmem:[%s1596_s3 + $0x110] sm:$0xff] %vm663_vm1, %v515_v22  ;;  %v928_v24 = vpop.f32.mrb[4].mxu1  ;;  %v370_v25 = vadd.f32 %v880_v23, %v1271_v6  ;;  %v364_v27 = vpop.f32.mrb[5].mxu0 }
  0xe9   :  { %v530_v26 = vadd.f32 %v928_v24, %v1271_v6  ;;  %v524_v28 = vpop.f32.mrb[5].mxu1  ;;  %v365_v29 = vadd.f32 %v364_v27, %v1271_v6 }
  0xea   :  { %v525_v30 = vadd.f32 %v524_v28, %v1271_v6  ;;  %669 = vst.msk [vmem:[%s1596_s3 + $0x28] sm:$0xff] %vm663_vm1, %v370_v25 }
  0xeb   :  { %701 = vst.msk [vmem:[%s1596_s3 + $0x128] sm:$0xff] %vm663_vm1, %v530_v26  ;;  %668 = vst.msk [vmem:[%s1596_s3 + $0x20] sm:$0xff] %vm663_vm1, %v365_v29  ;;  %v883_v31 = vpop.f32.mrb[6].mxu0 }
  0xec   :  { %700 = vst.msk [vmem:[%s1596_s3 + $0x120] sm:$0xff] %vm663_vm1, %v525_v30  ;;  %v931_v32 = vpop.f32.mrb[6].mxu1  ;;  %v380_v33 = vadd.f32 %v883_v31, %v1271_v6  ;;  %v374_v35 = vpop.f32.mrb[7].mxu0 }
  0xed   :  { %v540_v34 = vadd.f32 %v931_v32, %v1271_v6  ;;  %v534_v36 = vpop.f32.mrb[7].mxu1  ;;  %v375_v37 = vadd.f32 %v374_v35, %v1271_v6 }
  0xee   :  { %v535_v38 = vadd.f32 %v534_v36, %v1271_v6  ;;  %671 = vst.msk [vmem:[%s1596_s3 + $0x38] sm:$0xff] %vm663_vm1, %v380_v33 }
  0xef   :  { %703 = vst.msk [vmem:[%s1596_s3 + $0x138] sm:$0xff] %vm663_vm1, %v540_v34  ;;  %670 = vst.msk [vmem:[%s1596_s3 + $0x30] sm:$0xff] %vm663_vm1, %v375_v37  ;;  %v886_v39 = vpop.f32.mrb[8].mxu0 }
  0xf0   :  { %702 = vst.msk [vmem:[%s1596_s3 + $0x130] sm:$0xff] %vm663_vm1, %v535_v38  ;;  %v934_v40 = vpop.f32.mrb[8].mxu1  ;;  %v390_v41 = vadd.f32 %v886_v39, %v1271_v6  ;;  %v384_v43 = vpop.f32.mrb[9].mxu0 }
  0xf1   :  { %v550_v42 = vadd.f32 %v934_v40, %v1271_v6  ;;  %v544_v44 = vpop.f32.mrb[9].mxu1  ;;  %v385_v45 = vadd.f32 %v384_v43, %v1271_v6 }
  0xf2   :  { %v545_v46 = vadd.f32 %v544_v44, %v1271_v6  ;;  %673 = vst.msk [vmem:[%s1596_s3 + $0x48] sm:$0xff] %vm663_vm1, %v390_v41 }
  0xf3   :  { %705 = vst.msk [vmem:[%s1596_s3 + $0x148] sm:$0xff] %vm663_vm1, %v550_v42  ;;  %672 = vst.msk [vmem:[%s1596_s3 + $0x40] sm:$0xff] %vm663_vm1, %v385_v45  ;;  %v889_v47 = vpop.f32.mrb[10].mxu0 }
  0xf4   :  { %704 = vst.msk [vmem:[%s1596_s3 + $0x140] sm:$0xff] %vm663_vm1, %v545_v46  ;;  %v937_v48 = vpop.f32.mrb[10].mxu1  ;;  %v400_v49 = vadd.f32 %v889_v47, %v1271_v6  ;;  %v394_v51 = vpop.f32.mrb[11].mxu0 }
  0xf5   :  { %v560_v50 = vadd.f32 %v937_v48, %v1271_v6  ;;  %v554_v52 = vpop.f32.mrb[11].mxu1  ;;  %v395_v53 = vadd.f32 %v394_v51, %v1271_v6 }
  0xf6   :  { %v555_v54 = vadd.f32 %v554_v52, %v1271_v6  ;;  %675 = vst.msk [vmem:[%s1596_s3 + $0x58] sm:$0xff] %vm663_vm1, %v400_v49 }
  0xf7   :  { %707 = vst.msk [vmem:[%s1596_s3 + $0x158] sm:$0xff] %vm663_vm1, %v560_v50  ;;  %674 = vst.msk [vmem:[%s1596_s3 + $0x50] sm:$0xff] %vm663_vm1, %v395_v53  ;;  %v892_v55 = vpop.f32.mrb[12].mxu0 }
  0xf8   :  { %706 = vst.msk [vmem:[%s1596_s3 + $0x150] sm:$0xff] %vm663_vm1, %v555_v54  ;;  %v940_v56 = vpop.f32.mrb[12].mxu1  ;;  %v410_v57 = vadd.f32 %v892_v55, %v1271_v6  ;;  %v404_v59 = vpop.f32.mrb[13].mxu0 }
  0xf9   :  { %v570_v58 = vadd.f32 %v940_v56, %v1271_v6  ;;  %v564_v60 = vpop.f32.mrb[13].mxu1  ;;  %v405_v61 = vadd.f32 %v404_v59, %v1271_v6 }
  0xfa   :  { %v565_v62 = vadd.f32 %v564_v60, %v1271_v6  ;;  %677 = vst.msk [vmem:[%s1596_s3 + $0x68] sm:$0xff] %vm663_vm1, %v410_v57 }
  0xfb   :  { %709 = vst.msk [vmem:[%s1596_s3 + $0x168] sm:$0xff] %vm663_vm1, %v570_v58  ;;  %676 = vst.msk [vmem:[%s1596_s3 + $0x60] sm:$0xff] %vm663_vm1, %v405_v61  ;;  %v895_v63 = vpop.f32.mrb[14].mxu0 }
  0xfc   :  { %708 = vst.msk [vmem:[%s1596_s3 + $0x160] sm:$0xff] %vm663_vm1, %v565_v62  ;;  %v943_v0 = vpop.f32.mrb[14].mxu1  ;;  %v420_v1 = vadd.f32 %v895_v63, %v1271_v6  ;;  %v414_v3 = vpop.f32.mrb[15].mxu0 }
  0xfd   :  { %v580_v2 = vadd.f32 %v943_v0, %v1271_v6  ;;  %v574_v4 = vpop.f32.mrb[15].mxu1  ;;  %v415_v5 = vadd.f32 %v414_v3, %v1271_v6 }
  0xfe   :  { %v575_v7 = vadd.f32 %v574_v4, %v1271_v6  ;;  %679 = vst.msk [vmem:[%s1596_s3 + $0x78] sm:$0xff] %vm663_vm1, %v420_v1 }
  0xff   :  { %711 = vst.msk [vmem:[%s1596_s3 + $0x178] sm:$0xff] %vm663_vm1, %v580_v2  ;;  %678 = vst.msk [vmem:[%s1596_s3 + $0x70] sm:$0xff] %vm663_vm1, %v415_v5  ;;  %v898_v8 = vpop.f32.mrb[16].mxu0 }
 0x100   :  { %710 = vst.msk [vmem:[%s1596_s3 + $0x170] sm:$0xff] %vm663_vm1, %v575_v7  ;;  %v946_v9 = vpop.f32.mrb[16].mxu1  ;;  %v430_v10 = vadd.f32 %v898_v8, %v1271_v6  ;;  %v424_v12 = vpop.f32.mrb[17].mxu0 }
 0x101   :  { %v590_v11 = vadd.f32 %v946_v9, %v1271_v6  ;;  %v584_v13 = vpop.f32.mrb[17].mxu1  ;;  %v425_v14 = vadd.f32 %v424_v12, %v1271_v6 }
 0x102   :  { %v585_v15 = vadd.f32 %v584_v13, %v1271_v6  ;;  %681 = vst.msk [vmem:[%s1596_s3 + $0x88] sm:$0xff] %vm663_vm1, %v430_v10 }
 0x103   :  { %713 = vst.msk [vmem:[%s1596_s3 + $0x188] sm:$0xff] %vm663_vm1, %v590_v11  ;;  %680 = vst.msk [vmem:[%s1596_s3 + $0x80] sm:$0xff] %vm663_vm1, %v425_v14  ;;  %v901_v16 = vpop.f32.mrb[18].mxu0 }
 0x104   :  { %712 = vst.msk [vmem:[%s1596_s3 + $0x180] sm:$0xff] %vm663_vm1, %v585_v15  ;;  %v949_v17 = vpop.f32.mrb[18].mxu1  ;;  %v440_v18 = vadd.f32 %v901_v16, %v1271_v6  ;;  %v434_v20 = vpop.f32.mrb[19].mxu0 }
 0x105   :  { %v600_v19 = vadd.f32 %v949_v17, %v1271_v6  ;;  %v594_v21 = vpop.f32.mrb[19].mxu1  ;;  %v435_v22 = vadd.f32 %v434_v20, %v1271_v6 }
 0x106   :  { %v595_v23 = vadd.f32 %v594_v21, %v1271_v6  ;;  %683 = vst.msk [vmem:[%s1596_s3 + $0x98] sm:$0xff] %vm663_vm1, %v440_v18 }
 0x107   :  { %715 = vst.msk [vmem:[%s1596_s3 + $0x198] sm:$0xff] %vm663_vm1, %v600_v19  ;;  %682 = vst.msk [vmem:[%s1596_s3 + $0x90] sm:$0xff] %vm663_vm1, %v435_v22  ;;  %v904_v24 = vpop.f32.mrb[20].mxu0 }
 0x108   :  { %714 = vst.msk [vmem:[%s1596_s3 + $0x190] sm:$0xff] %vm663_vm1, %v595_v23  ;;  %v952_v25 = vpop.f32.mrb[20].mxu1  ;;  %v450_v26 = vadd.f32 %v904_v24, %v1271_v6  ;;  %v444_v28 = vpop.f32.mrb[21].mxu0 }
 0x109   :  { %v610_v27 = vadd.f32 %v952_v25, %v1271_v6  ;;  %v604_v29 = vpop.f32.mrb[21].mxu1  ;;  %v445_v30 = vadd.f32 %v444_v28, %v1271_v6 }
 0x10a   :  { %v605_v31 = vadd.f32 %v604_v29, %v1271_v6  ;;  %685 = vst.msk [vmem:[%s1596_s3 + $0xa8] sm:$0xff] %vm663_vm1, %v450_v26 }
 0x10b   :  { %717 = vst.msk [vmem:[%s1596_s3 + $0x1a8] sm:$0xff] %vm663_vm1, %v610_v27  ;;  %684 = vst.msk [vmem:[%s1596_s3 + $0xa0] sm:$0xff] %vm663_vm1, %v445_v30  ;;  %v907_v32 = vpop.f32.mrb[22].mxu0 }
 0x10c   :  { %716 = vst.msk [vmem:[%s1596_s3 + $0x1a0] sm:$0xff] %vm663_vm1, %v605_v31  ;;  %v955_v33 = vpop.f32.mrb[22].mxu1  ;;  %v460_v34 = vadd.f32 %v907_v32, %v1271_v6  ;;  %v454_v36 = vpop.f32.mrb[23].mxu0 }
 0x10d   :  { %v620_v35 = vadd.f32 %v955_v33, %v1271_v6  ;;  %v614_v37 = vpop.f32.mrb[23].mxu1  ;;  %v455_v38 = vadd.f32 %v454_v36, %v1271_v6 }
 0x10e   :  { %v615_v39 = vadd.f32 %v614_v37, %v1271_v6  ;;  %687 = vst.msk [vmem:[%s1596_s3 + $0xb8] sm:$0xff] %vm663_vm1, %v460_v34 }
 0x10f   :  { %719 = vst.msk [vmem:[%s1596_s3 + $0x1b8] sm:$0xff] %vm663_vm1, %v620_v35  ;;  %686 = vst.msk [vmem:[%s1596_s3 + $0xb0] sm:$0xff] %vm663_vm1, %v455_v38  ;;  %v910_v40 = vpop.f32.mrb[24].mxu0 }
 0x110   :  { %718 = vst.msk [vmem:[%s1596_s3 + $0x1b0] sm:$0xff] %vm663_vm1, %v615_v39  ;;  %v958_v41 = vpop.f32.mrb[24].mxu1  ;;  %v470_v42 = vadd.f32 %v910_v40, %v1271_v6  ;;  %v464_v44 = vpop.f32.mrb[25].mxu0 }
 0x111   :  { %v630_v43 = vadd.f32 %v958_v41, %v1271_v6  ;;  %v624_v45 = vpop.f32.mrb[25].mxu1  ;;  %v465_v46 = vadd.f32 %v464_v44, %v1271_v6 }
 0x112   :  { %v625_v47 = vadd.f32 %v624_v45, %v1271_v6  ;;  %689 = vst.msk [vmem:[%s1596_s3 + $0xc8] sm:$0xff] %vm663_vm1, %v470_v42 }
 0x113   :  { %721 = vst.msk [vmem:[%s1596_s3 + $0x1c8] sm:$0xff] %vm663_vm1, %v630_v43  ;;  %688 = vst.msk [vmem:[%s1596_s3 + $0xc0] sm:$0xff] %vm663_vm1, %v465_v46  ;;  %v913_v48 = vpop.f32.mrb[26].mxu0 }
 0x114   :  { %720 = vst.msk [vmem:[%s1596_s3 + $0x1c0] sm:$0xff] %vm663_vm1, %v625_v47  ;;  %v961_v49 = vpop.f32.mrb[26].mxu1  ;;  %v480_v50 = vadd.f32 %v913_v48, %v1271_v6  ;;  %v474_v52 = vpop.f32.mrb[27].mxu0 }
 0x115   :  { %v640_v51 = vadd.f32 %v961_v49, %v1271_v6  ;;  %v634_v53 = vpop.f32.mrb[27].mxu1  ;;  %v475_v54 = vadd.f32 %v474_v52, %v1271_v6 }
 0x116   :  { %v635_v55 = vadd.f32 %v634_v53, %v1271_v6  ;;  %691 = vst.msk [vmem:[%s1596_s3 + $0xd8] sm:$0xff] %vm663_vm1, %v480_v50 }
 0x117   :  { %723 = vst.msk [vmem:[%s1596_s3 + $0x1d8] sm:$0xff] %vm663_vm1, %v640_v51  ;;  %690 = vst.msk [vmem:[%s1596_s3 + $0xd0] sm:$0xff] %vm663_vm1, %v475_v54  ;;  %v916_v56 = vpop.f32.mrb[28].mxu0 }
 0x118   :  { %722 = vst.msk [vmem:[%s1596_s3 + $0x1d0] sm:$0xff] %vm663_vm1, %v635_v55  ;;  %v964_v57 = vpop.f32.mrb[28].mxu1  ;;  %v490_v58 = vadd.f32 %v916_v56, %v1271_v6  ;;  %v484_v60 = vpop.f32.mrb[29].mxu0 }
 0x119   :  { %v650_v59 = vadd.f32 %v964_v57, %v1271_v6  ;;  %v644_v61 = vpop.f32.mrb[29].mxu1  ;;  %v485_v62 = vadd.f32 %v484_v60, %v1271_v6 }
 0x11a   :  { %v645_v63 = vadd.f32 %v644_v61, %v1271_v6  ;;  %693 = vst.msk [vmem:[%s1596_s3 + $0xe8] sm:$0xff] %vm663_vm1, %v490_v58 }
 0x11b   :  { %725 = vst.msk [vmem:[%s1596_s3 + $0x1e8] sm:$0xff] %vm663_vm1, %v650_v59  ;;  %692 = vst.msk [vmem:[%s1596_s3 + $0xe0] sm:$0xff] %vm663_vm1, %v485_v62  ;;  %v919_v0 = vpop.f32.mrb[30].mxu0 }
 0x11c   :  { %724 = vst.msk [vmem:[%s1596_s3 + $0x1e0] sm:$0xff] %vm663_vm1, %v645_v63  ;;  %v967_v1 = vpop.f32.mrb[30].mxu1  ;;  %v500_v2 = vadd.f32 %v919_v0, %v1271_v6  ;;  %v494_v4 = vpop.f32.mrb[31].mxu0 }
 0x11d   :  { %v660_v3 = vadd.f32 %v967_v1, %v1271_v6  ;;  %v654_v5 = vpop.f32.mrb[31].mxu1  ;;  %v495_v7 = vadd.f32 %v494_v4, %v1271_v6 }
 0x11e   :  { %v655_v8 = vadd.f32 %v654_v5, %v1271_v6  ;;  %695 = vst.msk [vmem:[%s1596_s3 + $0xf8] sm:$0xff] %vm663_vm1, %v500_v2 }
 0x11f   :  { %727 = vst.msk [vmem:[%s1596_s3 + $0x1f8] sm:$0xff] %vm663_vm1, %v660_v3  ;;  %694 = vst.msk [vmem:[%s1596_s3 + $0xf0] sm:$0xff] %vm663_vm1, %v495_v7 }
 0x120   :  { %726 = vst.msk [vmem:[%s1596_s3 + $0x1f0] sm:$0xff] %vm663_vm1, %v655_v8 }

</bundles_post_ra>
